<compile_context>
chip_gen: v7x
topology: tpu7x:2x2x1
jax: 0.10.0
libtpu: 0.0.40
codegen_flags: <defaults>
</compile_context>

<pallas_src>
import functools

import jax
import jax.numpy as jnp
from jax.experimental import pallas as pl
from jax.experimental.pallas import tpu as pltpu

LANES = 128
SUBLANES = 8
TARGET_BLOCK_ROWS = 8192   # 8192 x 128 f32 = 4 MiB per pipeline buffer
NUM_CORES = 2              # parallel grid axis; shards across TCs on v7x


def _sum_kernel(x_ref, o_ref, *, block_rows, rows_total, steps_per_core, needs_mask):
    c = pl.program_id(0)       # core (parallel) axis
    s = pl.program_id(1)       # sequential reduction axis

    @pl.when(s == 0)
    def _init():
        o_ref[...] = jnp.zeros_like(o_ref)

    vals = x_ref[...].astype(jnp.float32)            # (block_rows, LANES)
    nb = block_rows // SUBLANES

    def _accumulate(v):
        # Pure VPU add tree into the single-vreg resident output block.
        o_ref[...] += v.reshape(nb, SUBLANES, LANES).sum(axis=0)

    if needs_mask:
        row_start = (c * steps_per_core + s) * block_rows
        fully_valid = row_start + block_rows <= rows_total

        @pl.when(fully_valid)
        def _hot():
            _accumulate(vals)

        @pl.when(jnp.logical_not(fully_valid))
        def _tail():
            row = jax.lax.broadcasted_iota(jnp.int32, (block_rows, LANES), 0)
            _accumulate(jnp.where(row_start + row < rows_total, vals, 0.0))
    else:
        _accumulate(vals)


def pallas_mean(x):
    """Mean over all elements of x (any shape), computed with a Pallas kernel."""
    n = x.size
    flat = x.reshape(-1)                     # free for contiguous arrays
    rows_total = n // LANES                  # full lane rows handled in-kernel
    n_main = rows_total * LANES

    # <128-element lane remainder handled in the wrapper -- no full-array
    # jnp.pad pass over HBM on the ragged path.
    tail_sum = jnp.float32(0.0)
    if n_main < n:
        tail_sum = jnp.sum(flat[n_main:].astype(jnp.float32))

    if rows_total < SUBLANES:
        # TODO(synk): sub-1024-element inputs skip the kernel; the whole sum is
        # the tiny wrapper-side reduction.
        total = tail_sum + jnp.sum(flat[:n_main].astype(jnp.float32))
        return (total / n).astype(x.dtype)

    mat = flat[:n_main].reshape(rows_total, LANES)   # lane-dense view

    # Block rows: multiple of 8, up to 4 MiB f32 per pipeline buffer.
    block_rows = min(TARGET_BLOCK_ROWS, (rows_total // SUBLANES) * SUBLANES)
    num_blocks = pl.cdiv(rows_total, block_rows)
    num_cores = min(NUM_CORES, num_blocks)
    steps_per_core = pl.cdiv(num_blocks, num_cores)
    # Masking only needed when the grid over-covers the row range.
    needs_mask = (num_cores * steps_per_core * block_rows) != rows_total

    kernel = functools.partial(
        _sum_kernel,
        block_rows=block_rows,
        rows_total=rows_total,
        steps_per_core=steps_per_core,
        needs_mask=needs_mask,
    )

    def in_map(c, s):
        # Clamp so over-covering grid steps re-load a valid block (their
        # contribution is fully masked out in-kernel).
        return (jnp.minimum(c * steps_per_core + s, num_blocks - 1), 0)

    partials = pl.pallas_call(
        kernel,
        out_shape=jax.ShapeDtypeStruct((num_cores * SUBLANES, LANES), jnp.float32),
        grid_spec=pltpu.PrefetchScalarGridSpec(
            num_scalar_prefetch=0,
            grid=(num_cores, steps_per_core),
            in_specs=[pl.BlockSpec((block_rows, LANES), in_map)],
            out_specs=pl.BlockSpec((SUBLANES, LANES), lambda c, s: (c, 0)),
        ),
        compiler_params=pltpu.CompilerParams(
            dimension_semantics=("parallel", "arbitrary"),
        ),
    )(mat)

    total = jnp.sum(partials) + tail_sum
    return (total / n).astype(x.dtype)


if __name__ == "__main__":
    key = jax.random.PRNGKey(0)
    # Small NCHW-shaped input, consistent with a generic tensor fed to NLL.
    x = jax.random.normal(key, (2, 4, 16, 16), dtype=jnp.float32)

    result = jax.block_until_ready(pallas_mean(x))

    expected = jnp.mean(x)
    assert jnp.allclose(result, expected, atol=1e-5, rtol=1e-5), (result, expected)
    print("KERNEL_OK")
</pallas_src>

<mosaic_0001>
module attributes {stable_mosaic.version = 11 : i64} {
  func.func @_sum_kernel(%arg0: i32, %arg1: i32, %arg2: memref<16x128xf32, #tpu.memory_space<vmem>>, %arg3: memref<8x128xf32, #tpu.memory_space<vmem>>) attributes {dimension_semantics = [#tpu.dimension_semantics<parallel>, #tpu.dimension_semantics<arbitrary>], iteration_bounds = array<i64: 1, 1>, scalar_prefetch = 0 : i64, scratch_operands = 0 : i64, tpu.core_type = #tpu.core_type<tc>, window_params = [{transform_indices = @transform_0, window_bounds = array<i64: 16, 128>}, {transform_indices = @transform_1, window_bounds = array<i64: 8, 128>}]} {
    %c0_i32 = arith.constant 0 : i32
    %0 = arith.cmpi eq, %arg1, %c0_i32 : i32
    %1 = arith.extui %0 : i1 to i32
    %c0_i32_0 = arith.constant 0 : i32
    %2 = arith.cmpi ne, %1, %c0_i32_0 : i32
    scf.if %2 {
      %cst_6 = arith.constant 0.000000e+00 : f32
      %9 = vector.broadcast %cst_6 : f32 to vector<8x128xf32>
      %c0_7 = arith.constant 0 : index
      %c0_8 = arith.constant 0 : index
      %10 = vector.load %arg3[%c0_7, %c0_8] : memref<8x128xf32, #tpu.memory_space<vmem>>, vector<8x128xf32>
      tpu.vector_store %arg3[%c0_7, %c0_8], %9 {strides = array<i32>} : memref<8x128xf32, #tpu.memory_space<vmem>>, vector<8x128xf32>,
    } else {
    }
    %c0 = arith.constant 0 : index
    %c0_1 = arith.constant 0 : index
    %3 = vector.load %arg2[%c0, %c0_1] : memref<16x128xf32, #tpu.memory_space<vmem>>, vector<16x128xf32>
    %c0_2 = arith.constant 0 : index
    %c0_3 = arith.constant 0 : index
    %4 = vector.load %arg3[%c0_2, %c0_3] : memref<8x128xf32, #tpu.memory_space<vmem>>, vector<8x128xf32>
    %5 = vector.shape_cast %3 : vector<16x128xf32> to vector<2x8x128xf32>
    %cst = arith.constant dense<0.000000e+00> : vector<8x128xf32>
    %6 = vector.multi_reduction <add>, %5, %cst [0] : vector<2x8x128xf32> to vector<8x128xf32>
    %7 = arith.addf %4, %6 : vector<8x128xf32>
    %c0_4 = arith.constant 0 : index
    %c0_5 = arith.constant 0 : index
    %8 = vector.load %arg3[%c0_4, %c0_5] : memref<8x128xf32, #tpu.memory_space<vmem>>, vector<8x128xf32>
    tpu.vector_store %arg3[%c0_4, %c0_5], %7 {strides = array<i32>} : memref<8x128xf32, #tpu.memory_space<vmem>>, vector<8x128xf32>,
    return
  }
  func.func @transform_0(%arg0: i32, %arg1: i32) -> (i32, i32) {
    %c1_i32 = arith.constant 1 : i32
    %0 = arith.muli %arg0, %c1_i32 : i32
    %1 = arith.addi %0, %arg1 : i32
    %c0_i32 = arith.constant 0 : i32
    %2 = arith.minsi %1, %c0_i32 : i32
    %c0_i32_0 = arith.constant 0 : i32
    %c0_i32_1 = arith.constant 0 : i32
    return %2, %c0_i32_0 : i32, i32
  }
  func.func @transform_1(%arg0: i32, %arg1: i32) -> (i32, i32) {
    %c0_i32 = arith.constant 0 : i32
    %c0_i32_0 = arith.constant 0 : i32
    return %arg0, %c0_i32 : i32, i32
  }
}

</mosaic_0001>

<bundles_post_ra>
// kernel: tpu_custom_call.1
= control target key start
LH: loop header
LB: loop body
LE: loop exit
PB: predicated region body
PF: predicated region fallthrough
CT: control target
= control target key end

     0   :  { %6 = vsyncpa [#allocation3], 0  ;;  %s152_s0 = inlined_call_operand.hbm [shape: f32[16,128], index: 0, kind: input, shape index: {}]   ;;  %s153_s1 = inlined_call_operand.hbm [shape: f32[8,128], index: 1, kind: output, shape index: {}]  }
   0x1   :  { %7 = vsyncpa [#allocation4], 0  ;;  %s114_s6 = smov [#allocation2]   ;;  %s66_s10 = scalar_lea.hbm %s152_s0, 256 }
   0x2   :  { %s19_s7 = sshll.u32 %s114_s6, 4  ;;  %p67_p0 = scmp.ne.s32.totalorder %s152_s0, %s66_s10  ;;  %s20_s7 = int_to_ptr.vmem [resolvable:$true] %s19_s7 }
   0x3   :  { %p70_p1 = scmp.lt.u32.totalorder %s66_s10, %s152_s0 }
   0x5   :  { %p72_p2 = pnand %p70_p1, %p67_p0 }
   0x7   :  { %75 = shalt.err (!%p72_p2)
}
   0x8   :  { %s76_s15 = scalar_lea.vmem %s20_s7, 256  ;;  %p81_p4 = scmp.lt.s32.totalorder %s20_s7, %s20_s7 }
   0x9   :  { %p77_p3 = scmp.ne.s32.totalorder %s20_s7, %s76_s15  ;;  %p82_p5 = scmp.lt.s32.totalorder %s76_s15, %s76_s15 }
   0xb   :  { %p83_p6 = por %p82_p5, %p81_p4 }
   0xd   :  { %p84_p7 = pnand %p83_p6, %p77_p3 }
   0xf   :  { %87 = shalt.err (!%p84_p7)
}
  0x10   :  { %s115_s16 = smov 128   ;;  %s116_s17 = smov 8  }
  0x11   :  { %25 = dma.hbm_to_vmem [thread:$0]  %s152_s0, 256, %s20_s7, [#allocation3], %s115_s16, %s115_s16, %s116_s17  }
  0x12   :  { %110 = dma.done.wait [#allocation3], 256  }
  0x13   :  { %111 = vsyncadd [#allocation3], 4294967040  ;;  %v38_v0 = vld [vmem:[#allocation2] sm:$0xff]  ;;  %v39_v1 = vld [vmem:[#allocation2 + $0x8] sm:$0xff]  ;;  %s117_s20 = smov [#allocation5]  }
  0x14   :  { %s50_s21 = sshll.u32 %s117_s20, 4  ;;  %v41_v2 = vadd.f32 %v39_v1, %v38_v0  ;;  %s51_s21 = int_to_ptr.vmem [resolvable:$true] %s50_s21 }
  0x15   :  { %s88_s22 = scalar_lea.vmem %s51_s21, 128  ;;  %p93_p9 = scmp.lt.s32.totalorder %s51_s21, %s51_s21 }
  0x16   :  { %43 = vst [vmem:[#allocation5] sm:$0xff] %v41_v2  ;;  %p89_p8 = scmp.ne.s32.totalorder %s51_s21, %s88_s22  ;;  %p94_p10 = scmp.lt.s32.totalorder %s88_s22, %s88_s22 }
  0x18   :  { %p95_p11 = por %p94_p10, %p93_p9 }
  0x1a   :  { %p96_p12 = pnand %p95_p11, %p89_p8 }
  0x1c   :  { %99 = shalt.err (!%p96_p12)
}
  0x1d   :  { %s100_s0 = scalar_lea.hbm %s153_s1, 128 }
  0x1e   :  { %p101_p13 = scmp.ne.s32.totalorder %s153_s1, %s100_s0  ;;  %p104_p0 = scmp.lt.u32.totalorder %s100_s0, %s153_s1 }
  0x20   :  { %p106_p1 = pnand %p104_p0, %p101_p13 }
  0x22   :  { %109 = shalt.err (!%p106_p1)
}
  0x23   :  { %53 = dma.vmem_to_hbm [thread:$0]  %s51_s21, 128, %s153_s1, [#allocation4]  }
  0x24   :  { %112 = dma.done.wait [#allocation4], 128  }
  0x25   :  { %113 = vsyncadd [#allocation4], 4294967168 }
  0x26   :  { %57 = vsyncpa [#allocation3], 1 }
  0x27   :  { %58 = vsyncpa [#allocation4], 1 }

</bundles_post_ra>
